<compile_context>
chip_gen: v5e
topology: v5e:2x2
jax: 0.10.0
libtpu: 0.0.40
codegen_flags: <defaults>
</compile_context>

<pallas_src>
import jax
import jax.numpy as jnp
from jax.experimental import pallas as pl
from jax.experimental.pallas import tpu as pltpu

HIDDEN = 64
H_PAD = 128          # hidden dim zero-padded to a full lane width


def _round_up(n, m):
    return (n + m - 1) // m * m


# ---------------------------------------------------------------------------
# Kernel: one batch tile -> fused MLP + both heads, narrow (2*O) output.
# ---------------------------------------------------------------------------
def dqn_kernel(x_ref, w1_ref, b1_ref, w2_ref, b2_ref, wh_ref, bh_ref, out_ref):
    # Cast x f32 -> bf16 inside the kernel (rides on VPU slack; avoids an
    # extra HBM read+write pass in the wrapper).
    x = x_ref[...].astype(jnp.bfloat16)

    # fc1 + ReLU : (TB, I)bf16 @ (I, 128)bf16 -> f32, bias/ReLU in f32
    h1 = jnp.dot(x, w1_ref[...], preferred_element_type=jnp.float32)
    h1 = jnp.maximum(h1 + b1_ref[...], 0.0)

    # fc2 + ReLU : (TB, 128) @ (128, 128)
    h2 = jnp.dot(h1.astype(w2_ref.dtype), w2_ref[...],
                 preferred_element_type=jnp.float32)
    h2 = jnp.maximum(h2 + b2_ref[...], 0.0)

    # fused heads (fc3 || fc_kl) -> (TB, 2*O); narrow f32 store (contiguous
    # HBM writeback since the block spans the full last axis).
    heads = jnp.dot(h2.astype(wh_ref.dtype), wh_ref[...],
                    preferred_element_type=jnp.float32) + bh_ref[...]
    out_ref[...] = heads.astype(out_ref.dtype)


# ---------------------------------------------------------------------------
# Wrapper
# ---------------------------------------------------------------------------
def dqn_forward(x, params, *, tile_b=4096):
    """x: (B, input_size) f32.  params: output of pack_params()."""
    B, I = x.shape
    out_size = params["out_size"]
    h_pad = params["w1"].shape[1]
    o2 = params["w_heads"].shape[1]          # 2 * out_size (narrow output)

    # Pad the batch only to a multiple of 8 (sublane), never to tile_b.
    B8 = _round_up(B, 8)
    if B8 != B:
        x = jnp.pad(x, ((0, B8 - B), (0, 0)))

    # Batch tile: large (amortizes per-step overhead) but guarantee >=2 grid
    # steps whenever there is more than one sublane-row of batch, so the
    # "parallel" grid axis can shard across both TCs on v7x.
    if B8 > 8:
        TB = min(tile_b, _round_up(pl.cdiv(B8, 2), 8))
    else:
        TB = B8
    grid = (pl.cdiv(B8, TB),)   # ragged last block handled by Pallas

    weights = (params["w1"], params["b1"], params["w2"], params["b2"],
               params["w_heads"], params["b_heads"])
    flops = 2 * B8 * (I * h_pad + h_pad * h_pad + h_pad * o2)
    bytes_accessed = (x.size * x.dtype.itemsize
                      + sum(int(w.size) * w.dtype.itemsize for w in weights)
                      + B8 * o2 * 4)

    out = pl.pallas_call(
        dqn_kernel,
        out_shape=jax.ShapeDtypeStruct((B8, o2), jnp.float32),
        grid=grid,
        in_specs=[
            pl.BlockSpec((TB, I), lambda i: (i, 0)),          # x: tiled on batch
            pl.BlockSpec((I, h_pad), lambda i: (0, 0)),       # w1 (VMEM-resident)
            pl.BlockSpec((1, h_pad), lambda i: (0, 0)),       # b1
            pl.BlockSpec((h_pad, h_pad), lambda i: (0, 0)),   # w2
            pl.BlockSpec((1, h_pad), lambda i: (0, 0)),       # b2
            pl.BlockSpec((h_pad, o2), lambda i: (0, 0)),      # fused heads W
            pl.BlockSpec((1, o2), lambda i: (0, 0)),          # fused heads b
        ],
        out_specs=pl.BlockSpec((TB, o2), lambda i: (i, 0)),
        compiler_params=pltpu.CompilerParams(
            dimension_semantics=("parallel",),
            vmem_limit_bytes=32 << 20,
        ),
        cost_estimate=pl.CostEstimate(
            flops=flops, transcendentals=0, bytes_accessed=bytes_accessed),
    )(x, *weights)

    # Narrow output: a single cheap row-slice, then column split.
    out = out[:B]
    return {"Q_reward": out[:, :out_size],
            "Q_KL": out[:, out_size:]}


# ---------------------------------------------------------------------------
# Parameter construction / packing
# ---------------------------------------------------------------------------
def init_raw_params(key, input_size, output_size, hidden=HIDDEN):
    """PyTorch-layout params: weight (out, in), bias (out,), uniform fan-in."""
    ks = jax.random.split(key, 8)

    def lin(kw, kb, fan_in, fan_out):
        bound = 1.0 / jnp.sqrt(jnp.float32(fan_in))
        w = jax.random.uniform(kw, (fan_out, fan_in), jnp.float32, -bound, bound)
        b = jax.random.uniform(kb, (fan_out,), jnp.float32, -bound, bound)
        return w, b

    w1, b1 = lin(ks[0], ks[1], input_size, hidden)
    w2, b2 = lin(ks[2], ks[3], hidden, hidden)
    w3, b3 = lin(ks[4], ks[5], hidden, output_size)
    wkl, bkl = lin(ks[6], ks[7], hidden, output_size)
    return {"w1": w1, "b1": b1, "w2": w2, "b2": b2,
            "w3": w3, "b3": b3, "wkl": wkl, "bkl": bkl}


def pack_params(raw, output_size):
    """Transpose to (in, out), pad hidden to 128, fuse heads (no col padding),
    cast weights to bf16 (MXU-native), keep biases f32."""
    def pad2(a, rows, cols):
        return jnp.pad(a, ((0, rows - a.shape[0]), (0, cols - a.shape[1])))

    in_size = raw["w1"].shape[1]

    w1 = pad2(raw["w1"].T, in_size, H_PAD)                 # (I, 128)
    b1 = pad2(raw["b1"][None, :], 1, H_PAD)                # (1, 128)
    w2 = pad2(raw["w2"].T, H_PAD, H_PAD)                   # (128, 128)
    b2 = pad2(raw["b2"][None, :], 1, H_PAD)                # (1, 128)
    # Fused heads: (64, 2*O) -> pad rows only (hidden 64 -> 128), keep 2*O cols.
    w_heads = jnp.concatenate([raw["w3"].T, raw["wkl"].T], axis=1)   # (64, 2O)
    b_heads = jnp.concatenate([raw["b3"], raw["bkl"]])[None, :]      # (1, 2O)
    w_heads = pad2(w_heads, H_PAD, w_heads.shape[1])       # (128, 2O)

    return {
        "w1": w1.astype(jnp.bfloat16), "b1": b1.astype(jnp.float32),
        "w2": w2.astype(jnp.bfloat16), "b2": b2.astype(jnp.float32),
        "w_heads": w_heads.astype(jnp.bfloat16),
        "b_heads": b_heads.astype(jnp.float32),
        "out_size": output_size,
    }


# ---------------------------------------------------------------------------
# Reference (mirrors the kernel's bf16-input / f32-accumulate numerics)
# ---------------------------------------------------------------------------
def jax_reference(x, raw, output_size):
    def bf(a):
        return a.astype(jnp.bfloat16).astype(jnp.float32)

    xf = bf(x)
    h1 = jnp.maximum(xf @ bf(raw["w1"].T) + raw["b1"], 0.0)
    h1 = bf(h1)
    h2 = jnp.maximum(h1 @ bf(raw["w2"].T) + raw["b2"], 0.0)
    h2 = bf(h2)
    q = h2 @ bf(raw["w3"].T) + raw["b3"]
    qkl = h2 @ bf(raw["wkl"].T) + raw["bkl"]
    return q, qkl


if __name__ == "__main__":
    key = jax.random.PRNGKey(0)
    k_x, k_p = jax.random.split(key)

    batch, input_size, output_size = 8, 16, 4
    x = jax.random.normal(k_x, (batch, input_size), jnp.float32)
    raw = init_raw_params(k_p, input_size, output_size)
    params = pack_params(raw, output_size)

    out = dqn_forward(x, params)
    jax.block_until_ready(out)

    q_ref, qkl_ref = jax_reference(x, raw, output_size)
    assert out["Q_reward"].shape == (batch, output_size)
    assert out["Q_KL"].shape == (batch, output_size)
    assert jnp.allclose(out["Q_reward"], q_ref, atol=1e-2, rtol=1e-2)
    assert jnp.allclose(out["Q_KL"], qkl_ref, atol=1e-2, rtol=1e-2)

    print("KERNEL_OK")
</pallas_src>

<mosaic_0001>
module attributes {stable_mosaic.version = 11 : i64} {
  func.func @dqn_kernel(%arg0: i32, %arg1: memref<8x16xf32, #tpu.memory_space<vmem>>, %arg2: memref<16x128xbf16, #tpu.memory_space<vmem>>, %arg3: memref<1x128xf32, #tpu.memory_space<vmem>>, %arg4: memref<128x128xbf16, #tpu.memory_space<vmem>>, %arg5: memref<1x128xf32, #tpu.memory_space<vmem>>, %arg6: memref<128x8xbf16, #tpu.memory_space<vmem>>, %arg7: memref<1x8xf32, #tpu.memory_space<vmem>>, %arg8: memref<8x8xf32, #tpu.memory_space<vmem>>) attributes {dimension_semantics = [#tpu.dimension_semantics<parallel>], iteration_bounds = array<i64: 1>, scalar_prefetch = 0 : i64, scratch_operands = 0 : i64, tpu.core_type = #tpu.core_type<tc>, window_params = [{transform_indices = @transform_0, window_bounds = array<i64: 8, 16>}, {pipeline_mode = #tpu.pipeline_mode<synchronous>, transform_indices = @transform_1, window_bounds = array<i64: 16, 128>}, {pipeline_mode = #tpu.pipeline_mode<synchronous>, transform_indices = @transform_2, window_bounds = array<i64: 1, 128>}, {pipeline_mode = #tpu.pipeline_mode<synchronous>, transform_indices = @transform_3, window_bounds = array<i64: 128, 128>}, {pipeline_mode = #tpu.pipeline_mode<synchronous>, transform_indices = @transform_4, window_bounds = array<i64: 1, 128>}, {pipeline_mode = #tpu.pipeline_mode<synchronous>, transform_indices = @transform_5, window_bounds = array<i64: 128, 8>}, {pipeline_mode = #tpu.pipeline_mode<synchronous>, transform_indices = @transform_6, window_bounds = array<i64: 1, 8>}, {transform_indices = @transform_7, window_bounds = array<i64: 8, 8>}]} {
    %c0 = arith.constant 0 : index
    %c0_0 = arith.constant 0 : index
    %0 = vector.load %arg1[%c0, %c0_0] : memref<8x16xf32, #tpu.memory_space<vmem>>, vector<8x16xf32>
    %1 = arith.truncf %0 : vector<8x16xf32> to vector<8x16xbf16>
    %c0_1 = arith.constant 0 : index
    %c0_2 = arith.constant 0 : index
    %2 = vector.load %arg2[%c0_1, %c0_2] : memref<16x128xbf16, #tpu.memory_space<vmem>>, vector<16x128xbf16>
    %cst = arith.constant dense<0.000000e+00> : vector<8x128xf32>
    %3 = tpu.matmul %1, %2, %cst {dimension_numbers = #tpu.dot_dimension_numbers<[1], [0], [0], [1], [0, 0, 1, 1], [], []>} : vector<8x16xbf16>, vector<16x128xbf16>, vector<8x128xf32> -> vector<8x128xf32>
    %c0_3 = arith.constant 0 : index
    %c0_4 = arith.constant 0 : index
    %4 = vector.load %arg3[%c0_3, %c0_4] : memref<1x128xf32, #tpu.memory_space<vmem>>, vector<1x128xf32>
    %5 = vector.broadcast %4 : vector<1x128xf32> to vector<8x128xf32>
    %6 = arith.addf %3, %5 : vector<8x128xf32>
    %cst_5 = arith.constant 0.000000e+00 : f32
    %7 = vector.broadcast %cst_5 : f32 to vector<8x128xf32>
    %8 = arith.maximumf %6, %7 : vector<8x128xf32>
    %9 = arith.truncf %8 : vector<8x128xf32> to vector<8x128xbf16>
    %c0_6 = arith.constant 0 : index
    %c0_7 = arith.constant 0 : index
    %10 = vector.load %arg4[%c0_6, %c0_7] : memref<128x128xbf16, #tpu.memory_space<vmem>>, vector<128x128xbf16>
    %cst_8 = arith.constant dense<0.000000e+00> : vector<8x128xf32>
    %11 = tpu.matmul %9, %10, %cst_8 {dimension_numbers = #tpu.dot_dimension_numbers<[1], [0], [0], [1], [0, 0, 1, 1], [], []>} : vector<8x128xbf16>, vector<128x128xbf16>, vector<8x128xf32> -> vector<8x128xf32>
    %c0_9 = arith.constant 0 : index
    %c0_10 = arith.constant 0 : index
    %12 = vector.load %arg5[%c0_9, %c0_10] : memref<1x128xf32, #tpu.memory_space<vmem>>, vector<1x128xf32>
    %13 = vector.broadcast %12 : vector<1x128xf32> to vector<8x128xf32>
    %14 = arith.addf %11, %13 : vector<8x128xf32>
    %cst_11 = arith.constant 0.000000e+00 : f32
    %15 = vector.broadcast %cst_11 : f32 to vector<8x128xf32>
    %16 = arith.maximumf %14, %15 : vector<8x128xf32>
    %17 = arith.truncf %16 : vector<8x128xf32> to vector<8x128xbf16>
    %c0_12 = arith.constant 0 : index
    %c0_13 = arith.constant 0 : index
    %18 = vector.load %arg6[%c0_12, %c0_13] : memref<128x8xbf16, #tpu.memory_space<vmem>>, vector<128x8xbf16>
    %cst_14 = arith.constant dense<0.000000e+00> : vector<8x8xf32>
    %19 = tpu.matmul %17, %18, %cst_14 {dimension_numbers = #tpu.dot_dimension_numbers<[1], [0], [0], [1], [0, 0, 1, 1], [], []>} : vector<8x128xbf16>, vector<128x8xbf16>, vector<8x8xf32> -> vector<8x8xf32>
    %c0_15 = arith.constant 0 : index
    %c0_16 = arith.constant 0 : index
    %20 = vector.load %arg7[%c0_15, %c0_16] : memref<1x8xf32, #tpu.memory_space<vmem>>, vector<1x8xf32>
    %21 = vector.broadcast %20 : vector<1x8xf32> to vector<8x8xf32>
    %22 = arith.addf %19, %21 : vector<8x8xf32>
    %c0_17 = arith.constant 0 : index
    %c0_18 = arith.constant 0 : index
    %23 = vector.load %arg8[%c0_17, %c0_18] : memref<8x8xf32, #tpu.memory_space<vmem>>, vector<8x8xf32>
    tpu.vector_store %arg8[%c0_17, %c0_18], %22 {strides = array<i32>} : memref<8x8xf32, #tpu.memory_space<vmem>>, vector<8x8xf32>,
    return
  }
  func.func @transform_0(%arg0: i32) -> (i32, i32) {
    %c0_i32 = arith.constant 0 : i32
    %c0_i32_0 = arith.constant 0 : i32
    return %arg0, %c0_i32 : i32, i32
  }
  func.func @transform_1(%arg0: i32) -> (i32, i32) {
    %c0_i32 = arith.constant 0 : i32
    %c0_i32_0 = arith.constant 0 : i32
    %c0_i32_1 = arith.constant 0 : i32
    return %c0_i32, %c0_i32_0 : i32, i32
  }
  func.func @transform_2(%arg0: i32) -> (i32, i32) {
    %c0_i32 = arith.constant 0 : i32
    %c0_i32_0 = arith.constant 0 : i32
    %c0_i32_1 = arith.constant 0 : i32
    return %c0_i32, %c0_i32_0 : i32, i32
  }
  func.func @transform_3(%arg0: i32) -> (i32, i32) {
    %c0_i32 = arith.constant 0 : i32
    %c0_i32_0 = arith.constant 0 : i32
    %c0_i32_1 = arith.constant 0 : i32
    return %c0_i32, %c0_i32_0 : i32, i32
  }
  func.func @transform_4(%arg0: i32) -> (i32, i32) {
    %c0_i32 = arith.constant 0 : i32
    %c0_i32_0 = arith.constant 0 : i32
    %c0_i32_1 = arith.constant 0 : i32
    return %c0_i32, %c0_i32_0 : i32, i32
  }
  func.func @transform_5(%arg0: i32) -> (i32, i32) {
    %c0_i32 = arith.constant 0 : i32
    %c0_i32_0 = arith.constant 0 : i32
    %c0_i32_1 = arith.constant 0 : i32
    return %c0_i32, %c0_i32_0 : i32, i32
  }
  func.func @transform_6(%arg0: i32) -> (i32, i32) {
    %c0_i32 = arith.constant 0 : i32
    %c0_i32_0 = arith.constant 0 : i32
    %c0_i32_1 = arith.constant 0 : i32
    return %c0_i32, %c0_i32_0 : i32, i32
  }
  func.func @transform_7(%arg0: i32) -> (i32, i32) {
    %c0_i32 = arith.constant 0 : i32
    %c0_i32_0 = arith.constant 0 : i32
    return %arg0, %c0_i32 : i32, i32
  }
}

</mosaic_0001>

<bundles_post_ra>
// kernel: tpu_custom_call.1
= control target key start
LH: loop header
LB: loop body
LE: loop exit
PB: predicated region body
PF: predicated region fallthrough
CT: control target
= control target key end

     0   :  { %12 = vsyncpa [#allocation3], 0  ;;  %s558_s0 = inlined_call_operand.hbm [shape: f32[8,16], index: 0, kind: input, shape index: {}]   ;;  %s559_s1 = inlined_call_operand.hbm [shape: bf16[16,128], index: 1, kind: input, shape index: {}]   ;;  %s560_s2 = inlined_call_operand.vmem [shape: f32[1,128], index: 2, kind: input, shape index: {}]   ;;  %s561_s3 = inlined_call_operand.vmem [shape: bf16[128,128], index: 3, kind: input, shape index: {}]   ;;  %s562_s4 = inlined_call_operand.vmem [shape: f32[1,128], index: 4, kind: input, shape index: {}]   ;;  %s563_s5 = inlined_call_operand.vmem [shape: bf16[128,8], index: 5, kind: input, shape index: {}]   ;;  %s564_s6 = inlined_call_operand.vmem [shape: f32[1,8], index: 6, kind: input, shape index: {}]   ;;  %s565_s7 = inlined_call_operand.hbm [shape: f32[8,8], index: 7, kind: output, shape index: {}]  }
   0x1   :  { %13 = vsyncpa [#allocation6], 0 }
   0x2   :  { %14 = vsyncpa [#allocation4], 0  ;;  %s20_s26 = sshll.u32 %s558_s0, 4  ;;  %s447_s27 = smov [#allocation2]   ;;  %s21_s26 = int_to_ptr.hbm [resolvable:$true] %s20_s26 }
   0x3   :  { %s22_s28 = sshll.u32 %s447_s27, 4  ;;  %s30_s8 = sshll.u32 %s559_s1, 4  ;;  %s23_s28 = int_to_ptr.vmem [resolvable:$true] %s22_s28  ;;  %s31_s8 = int_to_ptr.hbm [resolvable:$true] %s30_s8 }
   0x4   :  { %25 = dma.hbm_to_vmem [thread:$0]  %s21_s26, 128, %s23_s28, [#allocation3]  }
   0x5   :  { %s448_s9 = smov [#allocation5]   ;;  %s449_s11 = smov 64  }
   0x6   :  { %s32_s10 = sshll.u32 %s448_s9, 4  ;;  %s450_s12 = smov 4   ;;  %s33_s10 = int_to_ptr.vmem [resolvable:$true] %s32_s10 }
   0x7   :  { %38 = dma.hbm_to_vmem [thread:$0]  %s31_s8, 128, %s33_s10, [#allocation6], %s449_s11, %s449_s11, %s450_s12  }
   0x8   :  { %441 = dma.done.wait [#allocation3], 128  }
   0x9   :  { %442 = vsyncadd [#allocation3], 4294967168 }
   0xa   :  { %443 = dma.done.wait [#allocation6], 128  }
   0xb   :  { %444 = vsyncadd [#allocation6], 4294967168  ;;  %v344_v0 = vld [vmem:[#allocation5] sm:$0xff]  ;;  %v58_v1 = vld [vmem:[#allocation2] sm:$0xff]  ;;  %vm72_vm0 = vcmask 130048   ;;  %s451_s22 = smov [#allocation7]  }
   0xc   :  { %v352_v2 = vld [vmem:[%s561_s3 + $0x38] sm:$0xff]  ;;  %v59_v3 = vpack.c.bf16 %v58_v1, %v58_v1  ;;  %83 = vmatpush.bf16.msra.mxu0 %v344_v0  ;;  %v351_v4 = vld [vmem:[%s561_s3 + $0x30] sm:$0xff]  ;;  %v350_v5 = vld [vmem:[%s561_s3 + $0x28] sm:$0xff]  ;;  %s262_s23 = sshll.u32 %s451_s22, 4  ;;  %vm255_vm1 = vcmask 64512   ;;  %s263_s23 = int_to_ptr.vmem [resolvable:$true] %s262_s23 }
   0xd   :  { %159 = vmatpush.bf16.msra.mxu1 %v352_v2  ;;  %v349_v6 = vld [vmem:[%s561_s3 + $0x20] sm:$0xff]  ;;  %v348_v7 = vld [vmem:[%s561_s3 + $0x18] sm:$0xff]  ;;  %v347_v8 = vld [vmem:[%s561_s3 + $0x10] sm:$0xff] }
   0xe   :  { %v346_v9 = vld [vmem:[%s561_s3 + $0x8] sm:$0xff]  ;;  %v345_v10 = vld [vmem:[%s561_s3] sm:$0xff]  ;;  %v360_v11 = vld [vmem:[%s563_s5 + $0x38] sm:$0xff] }
   0xf   :  { %279 = vmatmul.msk.bf16.vlgmr.msra.gmra.mxu0 %vm72_vm0, %v59_v3  ;;  %242 = vmatpush.bf16.msra.mxu2 %v360_v11  ;;  %v359_v12 = vld [vmem:[%s563_s5 + $0x30] sm:$0xff]  ;;  %v358_v13 = vld [vmem:[%s563_s5 + $0x28] sm:$0xff]  ;;  %v357_v14 = vld [vmem:[%s563_s5 + $0x20] sm:$0xff] }
  0x10   :  { %v356_v15 = vld [vmem:[%s563_s5 + $0x18] sm:$0xff]  ;;  %v355_v16 = vld [vmem:[%s563_s5 + $0x10] sm:$0xff]  ;;  %v366_v17 = vld [vmem:[%s560_s2] ss:$0 sm:$0xff] }
  0x11   :  { %160 = vmatpush.bf16.msra.mxu1 %v351_v4  ;;  %v354_v23 = vld [vmem:[%s563_s5 + $0x8] sm:$0xff]  ;;  %v353_v24 = vld [vmem:[%s563_s5] sm:$0xff]  ;;  %s264_s5 = sshll.u32 %s565_s7, 4  ;;  %s265_s5 = int_to_ptr.hbm [resolvable:$true] %s264_s5 }
  0x12   :  { %v367_v25 = vld [vmem:[%s562_s4] ss:$0 sm:$0xff] }
  0x13   :  { %243 = vmatpush.bf16.msra.mxu2 %v359_v12  ;;  %v368_v31 = vld [vmem:[%s564_s6] ss:$0 sm:$0xff] }
  0x15   :  { %161 = vmatpush.bf16.msra.mxu1 %v350_v5 }
  0x17   :  { %244 = vmatpush.bf16.msra.mxu2 %v358_v13 }
  0x19   :  { %162 = vmatpush.bf16.msra.mxu1 %v349_v6 }
  0x1b   :  { %245 = vmatpush.bf16.msra.mxu2 %v357_v14 }
  0x1d   :  { %163 = vmatpush.bf16.msra.mxu1 %v348_v7 }
  0x1f   :  { %246 = vmatpush.bf16.msra.mxu2 %v356_v15 }
  0x21   :  { %164 = vmatpush.bf16.msra.mxu1 %v347_v8 }
  0x23   :  { %247 = vmatpush.bf16.msra.mxu2 %v355_v16 }
  0x25   :  { %165 = vmatpush.bf16.msra.mxu1 %v346_v9 }
  0x27   :  { %248 = vmatpush.bf16.msra.mxu2 %v354_v23 }
  0x29   :  { %166 = vmatpush.bf16.msra.mxu1 %v345_v10 }
  0x2b   :  { %249 = vmatpush.bf16.msra.mxu2 %v353_v24 }
  0x8c   :  { %v85_v18 = vpop.f32.mrf.mxu0 }
  0x8d   :  { %v86_v19 = vadd.f32 %v366_v17, %v85_v18 }
  0x8f   :  { %v89_v20 = vmax.f32 %v86_v19, 0.0 }
  0x91   :  { %v90_v21 = vpack.c.bf16 %v89_v20, %v89_v20 }
  0x93   :  { %167 = vmatmul.bf16.vlgmr.msra.gmra.mxu1 %v90_v21 }
  0x94   :  { %v87_v22 = vpop.f32.mrf.mxu0 }
 0x110   :  { %v168_v26 = vpop.f32.mrf.mxu1 }
 0x111   :  { %v169_v27 = vadd.f32 %v367_v25, %v168_v26 }
 0x113   :  { %v172_v28 = vmax.f32 %v169_v27, 0.0 }
 0x115   :  { %v173_v29 = vpack.c.bf16 %v172_v28, %v172_v28 }
 0x117   :  { %250 = vmatmul.bf16.vlgmr.msra.gmra.mxu2 %v173_v29 }
 0x118   :  { %v170_v30 = vpop.f32.mrf.mxu1 }
 0x19a   :  { %v251_v32 = vpop.f32.mrf.mxu2 }
 0x19b   :  { %v252_v33 = vadd.f32 %v368_v31, %v251_v32 }
 0x19d   :  { %256 = vst.msk [vmem:[#allocation7] sm:$0xff] %vm255_vm1, %v252_v33 }
 0x19e   :  { %267 = dma.vmem_to_hbm [thread:$0]  %s263_s23, 128, %s265_s5, [#allocation4]  }
 0x1a2   :  { %v253_v34 = vpop.f32.mrf.mxu2 }
 0x1a3   :  { %445 = dma.done.wait [#allocation4], 128  }
 0x1a4   :  { %446 = vsyncadd [#allocation4], 4294967168 }
 0x1a5   :  { %272 = vsyncpa [#allocation3], 1 }
 0x1a6   :  { %273 = vsyncpa [#allocation6], 1 }
 0x1a7   :  { %274 = vsyncpa [#allocation4], 1 }

</bundles_post_ra>
